<compile_context>
chip_gen: v5e
topology: v5e:2x2
jax: 0.10.0
libtpu: 0.0.40
codegen_flags: <defaults>
</compile_context>

<pallas_src>
import functools

import jax
import jax.numpy as jnp
from jax import lax
from jax.experimental import pallas as pl
from jax.experimental.pallas import tpu as pltpu


def mlp_actor_kernel(x_ref, w1_ref, b1_ref, w2_ref, b2_ref, w3_ref, b3_ref,
                     out_ref, *, act_limit):
    """Transposed (lane-dense) MLP forward.

    x_ref  : [tb, state_dim]           obs tile, natural batch-major layout
    wK_ref : [out_features, in_features]  PyTorch weight layout (compute dtype)
    bK_ref : [out_features, 1]          f32 biases, broadcast along lanes
    out_ref: [action_dim, tb]           batch rides the lane dim -> dense vst
    """
    x = x_ref[...]

    # Layer 1: h[h0, tb] = W1 · xᵀ  (contract state_dim of both operands;
    # batch becomes the MXU N dimension -> well-shaped matmul for free).
    h = lax.dot_general(w1_ref[...], x,
                        dimension_numbers=(((1,), (1,)), ((), ())),
                        preferred_element_type=jnp.float32)
    h = jnp.maximum(h + b1_ref[...], 0.0)

    # Layer 2: h[h1, tb] = W2 · h   (f32 accumulation, compute-dtype MXU inputs).
    h = jnp.dot(w2_ref[...], h.astype(w2_ref.dtype),
                preferred_element_type=jnp.float32)
    h = jnp.maximum(h + b2_ref[...], 0.0)

    # Output layer: [action_dim, tb], Tanh (EUP, f32), scaled in-kernel.
    h = jnp.dot(w3_ref[...], h.astype(w3_ref.dtype),
                preferred_element_type=jnp.float32)
    out_ref[...] = (act_limit * jnp.tanh(h + b3_ref[...])).astype(out_ref.dtype)


def _round_up(x, m):
    return ((x + m - 1) // m) * m


def mlp_actor_forward(obs, params, act_limit, *,
                      compute_dtype=jnp.float32,
                      block_batch=2048,
                      small_batch_threshold=256):
    """obs: [B, state_dim]; params: w1,b1,w2,b2,w3,b3 (weights [out,in], biases [out,1]).

    Returns actions [B, action_dim] (f32). compute_dtype=jnp.bfloat16 halves
    obs/weight HBM traffic and feeds the MXU at native rate; accumulation and
    all activations remain f32.
    """
    w1 = params["w1"].astype(compute_dtype)
    w2 = params["w2"].astype(compute_dtype)
    w3 = params["w3"].astype(compute_dtype)
    b1 = params["b1"].astype(jnp.float32)
    b2 = params["b2"].astype(jnp.float32)
    b3 = params["b3"].astype(jnp.float32)

    B, state_dim = obs.shape
    action_dim = w3.shape[0]

    # bf16 cast happens here (wrapper), not inside the kernel, so the obs DMA
    # itself moves half the bytes.
    obs_c = obs.astype(compute_dtype)

    kernel = functools.partial(mlp_actor_kernel, act_limit=float(act_limit))

    # --- tiny-batch path: everything in one VMEM block, no grid ---
    if B <= small_batch_threshold:
        vmem = pl.BlockSpec(memory_space=pltpu.MemorySpace.VMEM)
        out_t = pl.pallas_call(
            kernel,
            out_shape=jax.ShapeDtypeStruct((action_dim, B), jnp.float32),
            in_specs=[vmem] * 7,
            out_specs=vmem,
        )(obs_c, w1, b1, w2, b2, w3, b3)
        return out_t.T

    # --- batch-tiled path ---
    # Tile so the grid has >= 2 steps (v7x megacore via "parallel" semantics)
    # but cap at block_batch; tb is a multiple of 128 so the [action_dim, tb]
    # output store is a full-lane (unmasked) vst and bf16 sublane packing of
    # the obs tile is satisfied.
    tb = min(int(block_batch), max(128, _round_up(pl.cdiv(B, 2), 128)))
    grid = (pl.cdiv(B, tb),)   # ragged last tile is masked by Pallas (no pad).

    out_t = pl.pallas_call(
        kernel,
        out_shape=jax.ShapeDtypeStruct((action_dim, B), jnp.float32),
        grid=grid,
        in_specs=[
            pl.BlockSpec((tb, state_dim), lambda i: (i, 0)),   # obs: batch-tiled
            pl.BlockSpec(w1.shape, lambda i: (0, 0)),          # weights/biases:
            pl.BlockSpec(b1.shape, lambda i: (0, 0)),          # resident in VMEM
            pl.BlockSpec(w2.shape, lambda i: (0, 0)),          # across all steps
            pl.BlockSpec(b2.shape, lambda i: (0, 0)),
            pl.BlockSpec(w3.shape, lambda i: (0, 0)),
            pl.BlockSpec(b3.shape, lambda i: (0, 0)),
        ],
        out_specs=pl.BlockSpec((action_dim, tb), lambda i: (0, i)),
        compiler_params=pltpu.CompilerParams(
            dimension_semantics=("parallel",)),  # shards tiles across v7x TCs
    )(obs_c, w1, b1, w2, b2, w3, b3)
    return out_t.T


def init_params(key, state_dim, hidden_dim, action_dim):
    """Deterministic init mimicking torch.nn.Linear (U[-1/sqrt(fan_in), +]).

    Weights in PyTorch layout [out, in]; biases [out, 1].
    """
    sizes = [state_dim] + list(hidden_dim) + [action_dim]
    params = {}
    for j in range(len(sizes) - 1):
        fan_in, fan_out = sizes[j], sizes[j + 1]
        key, kw, kb = jax.random.split(key, 3)
        bound = fan_in ** -0.5
        params[f"w{j + 1}"] = jax.random.uniform(
            kw, (fan_out, fan_in), jnp.float32, -bound, bound)
        params[f"b{j + 1}"] = jax.random.uniform(
            kb, (fan_out, 1), jnp.float32, -bound, bound)
    return params


def reference_forward(obs, params, act_limit, compute_dtype=jnp.float32):
    """Pure-JAX reference mirroring the kernel's compute-dtype path."""
    def lin(x, w, b):
        y = jnp.dot(x.astype(compute_dtype), w.astype(compute_dtype).T,
                    preferred_element_type=jnp.float32)
        return y + b.astype(jnp.float32).T
    h = jnp.maximum(lin(obs, params["w1"], params["b1"]), 0.0)
    h = jnp.maximum(lin(h, params["w2"], params["b2"]), 0.0)
    return act_limit * jnp.tanh(lin(h, params["w3"], params["b3"]))


if __name__ == "__main__":
    state_dim = 16
    hidden_dim = [32, 32]
    action_dim = 8
    act_limit = 2.0

    key = jax.random.PRNGKey(0)
    key, k_obs_small, k_obs_big = jax.random.split(key, 3)
    params = init_params(key, state_dim, hidden_dim, action_dim)

    # --- tiny batch, f32 compute: exercises the no-grid single-block path ---
    obs_small = jax.random.normal(k_obs_small, (8, state_dim), jnp.float32)
    out_small = jax.block_until_ready(
        mlp_actor_forward(obs_small, params, act_limit,
                          compute_dtype=jnp.float32))
    ref_small = reference_forward(obs_small, params, act_limit,
                                  compute_dtype=jnp.float32)
    assert out_small.shape == (8, action_dim)
    assert jnp.allclose(out_small, ref_small, atol=5e-5, rtol=1e-5), \
        "f32 path mismatch vs reference"

    # --- larger batch, bf16 obs/weights: tiled, lane-dense, 2-step parallel grid ---
    batch_big = 1024
    obs_big = jax.random.normal(k_obs_big, (batch_big, state_dim), jnp.float32)
    out_big = jax.block_until_ready(
        mlp_actor_forward(obs_big, params, act_limit,
                          compute_dtype=jnp.bfloat16))
    ref_big = reference_forward(obs_big, params, act_limit,
                                compute_dtype=jnp.bfloat16)
    assert out_big.shape == (batch_big, action_dim)
    assert jnp.allclose(out_big, ref_big, atol=2e-2, rtol=2e-2), \
        "bf16 path mismatch vs reference"

    print("KERNEL_OK")
</pallas_src>

<mosaic_0001>
module attributes {stable_mosaic.version = 11 : i64} {
  func.func @mlp_actor_kernel(%arg0: memref<8x16xf32, #tpu.memory_space<vmem>>, %arg1: memref<32x16xf32, #tpu.memory_space<vmem>>, %arg2: memref<32x1xf32, #tpu.memory_space<vmem>>, %arg3: memref<32x32xf32, #tpu.memory_space<vmem>>, %arg4: memref<32x1xf32, #tpu.memory_space<vmem>>, %arg5: memref<8x32xf32, #tpu.memory_space<vmem>>, %arg6: memref<8x1xf32, #tpu.memory_space<vmem>>, %arg7: memref<8x8xf32, #tpu.memory_space<vmem>>) attributes {dimension_semantics = [], scalar_prefetch = 0 : i64, scratch_operands = 0 : i64, tpu.core_type = #tpu.core_type<tc>} {
    %c0 = arith.constant 0 : index
    %c0_0 = arith.constant 0 : index
    %0 = vector.load %arg0[%c0, %c0_0] : memref<8x16xf32, #tpu.memory_space<vmem>>, vector<8x16xf32>
    %c0_1 = arith.constant 0 : index
    %c0_2 = arith.constant 0 : index
    %1 = vector.load %arg1[%c0_1, %c0_2] : memref<32x16xf32, #tpu.memory_space<vmem>>, vector<32x16xf32>
    %cst = arith.constant dense<0.000000e+00> : vector<32x8xf32>
    %2 = tpu.matmul %1, %0, %cst {dimension_numbers = #tpu.dot_dimension_numbers<[1], [1], [0], [0], [0, 0, 1, 0], [], []>} : vector<32x16xf32>, vector<8x16xf32>, vector<32x8xf32> -> vector<32x8xf32>
    %c0_3 = arith.constant 0 : index
    %c0_4 = arith.constant 0 : index
    %3 = vector.load %arg2[%c0_3, %c0_4] : memref<32x1xf32, #tpu.memory_space<vmem>>, vector<32x1xf32>
    %4 = vector.broadcast %3 : vector<32x1xf32> to vector<32x8xf32>
    %5 = arith.addf %2, %4 : vector<32x8xf32>
    %cst_5 = arith.constant 0.000000e+00 : f32
    %6 = vector.broadcast %cst_5 : f32 to vector<32x8xf32>
    %7 = arith.maximumf %5, %6 : vector<32x8xf32>
    %c0_6 = arith.constant 0 : index
    %c0_7 = arith.constant 0 : index
    %8 = vector.load %arg3[%c0_6, %c0_7] : memref<32x32xf32, #tpu.memory_space<vmem>>, vector<32x32xf32>
    %cst_8 = arith.constant dense<0.000000e+00> : vector<32x8xf32>
    %9 = tpu.matmul %8, %7, %cst_8 {dimension_numbers = #tpu.dot_dimension_numbers<[1], [0], [0], [1], [0, 0, 1, 1], [], []>} : vector<32x32xf32>, vector<32x8xf32>, vector<32x8xf32> -> vector<32x8xf32>
    %c0_9 = arith.constant 0 : index
    %c0_10 = arith.constant 0 : index
    %10 = vector.load %arg4[%c0_9, %c0_10] : memref<32x1xf32, #tpu.memory_space<vmem>>, vector<32x1xf32>
    %11 = vector.broadcast %10 : vector<32x1xf32> to vector<32x8xf32>
    %12 = arith.addf %9, %11 : vector<32x8xf32>
    %cst_11 = arith.constant 0.000000e+00 : f32
    %13 = vector.broadcast %cst_11 : f32 to vector<32x8xf32>
    %14 = arith.maximumf %12, %13 : vector<32x8xf32>
    %c0_12 = arith.constant 0 : index
    %c0_13 = arith.constant 0 : index
    %15 = vector.load %arg5[%c0_12, %c0_13] : memref<8x32xf32, #tpu.memory_space<vmem>>, vector<8x32xf32>
    %cst_14 = arith.constant dense<0.000000e+00> : vector<8x8xf32>
    %16 = tpu.matmul %15, %14, %cst_14 {dimension_numbers = #tpu.dot_dimension_numbers<[1], [0], [0], [1], [0, 0, 1, 1], [], []>} : vector<8x32xf32>, vector<32x8xf32>, vector<8x8xf32> -> vector<8x8xf32>
    %c0_15 = arith.constant 0 : index
    %c0_16 = arith.constant 0 : index
    %17 = vector.load %arg6[%c0_15, %c0_16] : memref<8x1xf32, #tpu.memory_space<vmem>>, vector<8x1xf32>
    %18 = vector.broadcast %17 : vector<8x1xf32> to vector<8x8xf32>
    %19 = arith.addf %16, %18 : vector<8x8xf32>
    %20 = math.tanh %19 : vector<8x8xf32>
    %cst_17 = arith.constant 2.000000e+00 : f32
    %21 = vector.broadcast %cst_17 : f32 to vector<8x8xf32>
    %22 = arith.mulf %21, %20 : vector<8x8xf32>
    %c0_18 = arith.constant 0 : index
    %c0_19 = arith.constant 0 : index
    %23 = vector.load %arg7[%c0_18, %c0_19] : memref<8x8xf32, #tpu.memory_space<vmem>>, vector<8x8xf32>
    tpu.vector_store %arg7[%c0_18, %c0_19], %22 {strides = array<i32>} : memref<8x8xf32, #tpu.memory_space<vmem>>, vector<8x8xf32>,
    return
  }
}

</mosaic_0001>

<bundles_post_ra>
// kernel: tpu_custom_call.1
= control target key start
LH: loop header
LB: loop body
LE: loop exit
PB: predicated region body
PF: predicated region fallthrough
CT: control target
= control target key end

     0   :  { %vm56_vm0 = vcmask 130048   ;;  %v281_v3 = vmov 0   ;;  %s394_s0 = inlined_call_operand.vmem [shape: f32[8,16], index: 0, kind: input, shape index: {}]   ;;  %s395_s1 = inlined_call_operand.vmem [shape: f32[32,16], index: 1, kind: input, shape index: {}]   ;;  %s396_s2 = inlined_call_operand.vmem [shape: f32[32,1], index: 2, kind: input, shape index: {}]   ;;  %s397_s3 = inlined_call_operand.vmem [shape: f32[32,32], index: 3, kind: input, shape index: {}]   ;;  %s398_s4 = inlined_call_operand.vmem [shape: f32[32,1], index: 4, kind: input, shape index: {}]   ;;  %s399_s5 = inlined_call_operand.vmem [shape: f32[8,32], index: 5, kind: input, shape index: {}]   ;;  %s400_s6 = inlined_call_operand.vmem [shape: f32[8,1], index: 6, kind: input, shape index: {}]   ;;  %s401_s7 = inlined_call_operand.hbm [shape: f32[8,8], index: 7, kind: output, shape index: {}]  }
   0x1   :  { %v27_v0 = vld [vmem:[%s394_s0] sm:$0xff]  ;;  %v35_v1 = vld [vmem:[%s396_s2 + $0x18] sm:$0xff]  ;;  %251 = vset.pattern.permute.xlu1 %v281_v3  ;;  %v33_v4 = vld [vmem:[%s396_s2 + $0x8] sm:$0xff]  ;;  %250 = vset.pattern.permute.xlu0 %v281_v3 }
   0x2   :  { %229 = vmatpush.xpose.msk.msra.mxu0 %vm56_vm0, %v27_v0  ;;  %v28_v2 = vld [vmem:[%s395_s1] sm:$0xff]  ;;  %43 = vperm.xlu1 %251, %v33_v4   ;;  %v31_v5 = vld [vmem:[%s395_s1 + $0x18] sm:$0xff] }
   0x3   :  { %53 = vperm.xlu0 %250, %v35_v1   ;;  %239 = vmatpush.xpose.msk.msra.mxu1 %vm56_vm0, %v27_v0 }
   0x4   :  { %12 = vsyncpa [#allocation3], 0  ;;  %252 = vset.pattern.permute.xlu2 %v281_v3  ;;  %v32_v6 = vld [vmem:[%s396_s2] sm:$0xff]  ;;  %v34_v7 = vld [vmem:[%s396_s2 + $0x10] sm:$0xff]  ;;  %vm133_vm1 = vcmask 261120   ;;  %s282_s9 = smov [#allocation2]  }
   0x5   :  { %230 = vmatmul.msk.f32.vlgmr.msra.gmra.mxu0 %vm56_vm0, %v28_v2  ;;  %v29_v8 = vld [vmem:[%s395_s1 + $0x8] sm:$0xff]  ;;  %v109_v9 = vld [vmem:[%s398_s4] sm:$0xff]  ;;  %v30_v11 = vld [vmem:[%s395_s1 + $0x10] sm:$0xff]  ;;  %s218_s10 = sshll.u32 %s282_s9, 4  ;;  %s220_s13 = sshll.u32 %s401_s7, 4  ;;  %vm211_vm2 = vcmask 64512   ;;  %s219_s10 = int_to_ptr.vmem [resolvable:$true] %s218_s10  ;;  %s221_s13 = int_to_ptr.hbm [resolvable:$true] %s220_s13 }
   0x6   :  { %233 = vmatmul.msk.f32.vlgmr.msra.gmra.mxu1 %vm56_vm0, %v31_v5  ;;  %v110_v10 = vld [vmem:[%s398_s4 + $0x8] sm:$0xff]  ;;  %v112_v16 = vld [vmem:[%s398_s4 + $0x18] sm:$0xff]  ;;  %v111_v20 = vld [vmem:[%s398_s4 + $0x10] sm:$0xff] }
   0x7   :  { %130 = vperm.xlu2 %252, %v112_v16   ;;  %v180_v26 = vld [vmem:[%s400_s6] sm:$0xff]  ;;  %v106_v32 = vld [vmem:[%s397_s3 + $0x8] sm:$0xff]  ;;  %v107_v33 = vld [vmem:[%s397_s3 + $0x10] sm:$0xff] }
   0x8   :  { %v105_v31 = vld [vmem:[%s397_s3] sm:$0xff]  ;;  %v108_v34 = vld [vmem:[%s397_s3 + $0x18] sm:$0xff] }
   0x9   :  { %v179_v51 = vld [vmem:[%s399_s5] sm:$0xff] }
   0xa   :  { %38 = vperm.xlu1 %251, %v32_v6  }
   0xb   :  { %48 = vperm.xlu0 %250, %v34_v7  }
   0xd   :  { %231 = vmatmul.msk.f32.gmra.mxu0 %vm56_vm0, %v29_v8 }
   0xf   :  { %125 = vperm.xlu2 %252, %v111_v20  }
  0x12   :  { %115 = vperm.xlu1 %251, %v109_v9  }
  0x13   :  { %120 = vperm.xlu0 %250, %v110_v10  }
  0x15   :  { %232 = vmatmul.msk.f32.gmra.mxu0 %vm56_vm0, %v30_v11 }
  0x17   :  { %183 = vperm.xlu2 %252, %v180_v26  }
  0x61   :  { %v131_v35 = vpop.permute.xlu2 %130 }
  0x69   :  { %v126_v37 = vpop.permute.xlu2 %125 }
  0x71   :  { %v184_v52 = vpop.permute.xlu2 %183 }
  0x74   :  { %v44_v17 = vpop.permute.xlu1 %43 }
  0x75   :  { %v54_v13 = vpop.permute.xlu0 %53 }
  0x7c   :  { %v39_v21 = vpop.permute.xlu1 %38 }
  0x7d   :  { %v49_v22 = vpop.permute.xlu0 %48 }
  0x82   :  { %v89_v12 = vpop.f32.mrf.mxu0 }
  0x83   :  { %v98_v14 = vpop.f32.mrf.mxu1  ;;  %v90_v27 = vadd.f32 %v89_v12, %v39_v21 }
  0x84   :  { %v99_v15 = vadd.f32 %v98_v14, %v54_v13  ;;  %v116_v46 = vpop.permute.xlu1 %115 }
  0x85   :  { %v101_v30 = vmax.f32 %v90_v27, 0.0  ;;  %v121_v42 = vpop.permute.xlu0 %120 }
  0x86   :  { %v104_v18 = vmax.f32 %v99_v15, 0.0 }
  0x88   :  { %158 = vmatpush.msrb.mxu1 %v104_v18  ;;  %240 = vmatpush.msra.mxu2 %v104_v18 }
  0x89   :  { %241 = vmatpush.msra.mxu3 %v104_v18 }
  0x8a   :  { %v92_v19 = vpop.f32.mrf.mxu0 }
  0x8b   :  { %v93_v24 = vadd.f32 %v92_v19, %v44_v17 }
  0x8d   :  { %v102_v29 = vmax.f32 %v93_v24, 0.0 }
  0x92   :  { %v95_v23 = vpop.f32.mrf.mxu0 }
  0x93   :  { %v96_v25 = vadd.f32 %v95_v23, %v49_v22 }
  0x95   :  { %v103_v28 = vmax.f32 %v96_v25, 0.0 }
  0x97   :  { %159 = vmatpush.msrb.mxu1 %v103_v28  ;;  %242 = vmatpush.msra.mxu2 %v103_v28 }
  0x98   :  { %243 = vmatpush.msra.mxu3 %v103_v28 }
  0x99   :  { %160 = vmatpush.msrb.mxu1 %v102_v29  ;;  %244 = vmatpush.msra.mxu2 %v102_v29 }
  0x9a   :  { %245 = vmatpush.msra.mxu3 %v102_v29 }
  0x9b   :  { %161 = vmatpush.msrb.mxu1 %v101_v30  ;;  %246 = vmatpush.msra.mxu2 %v101_v30 }
  0x9c   :  { %247 = vmatpush.msra.mxu3 %v101_v30  ;;  %234 = vmatmul.msk.f32.vlgmr.msrb.gmra.mxu1 %vm133_vm1, %v105_v31 }
  0x9d   :  { %235 = vmatmul.msk.f32.vlgmr.msra.gmra.mxu2 %vm133_vm1, %v106_v32  ;;  %236 = vmatmul.msk.f32.vlgmr.msra.gmra.mxu3 %vm133_vm1, %v107_v33 }
  0xa5   :  { %237 = vmatmul.msk.f32.gmra.mxu3 %vm133_vm1, %v108_v34 }
 0x119   :  { %v163_v43 = vpop.f32.mrf.mxu1 }
 0x11a   :  { %v164_v47 = vadd.f32 %v163_v43, %v116_v46 }
 0x11c   :  { %v175_v50 = vmax.f32 %v164_v47, 0.0 }
 0x120   :  { %v169_v36 = vpop.f32.mrf.mxu3  ;;  %v166_v38 = vpop.f32.mrf.mxu2 }
 0x121   :  { %v170_v40 = vadd.f32 %v169_v36, %v126_v37  ;;  %v167_v44 = vadd.f32 %v166_v38, %v121_v42 }
 0x123   :  { %v177_v48 = vmax.f32 %v170_v40, 0.0  ;;  %v176_v49 = vmax.f32 %v167_v44, 0.0 }
 0x128   :  { %v172_v39 = vpop.f32.mrf.mxu3 }
 0x129   :  { %v173_v41 = vadd.f32 %v172_v39, %v131_v35 }
 0x12b   :  { %v178_v45 = vmax.f32 %v173_v41, 0.0 }
 0x12d   :  { %201 = vmatpush.msrb.mxu2 %v178_v45 }
 0x12f   :  { %202 = vmatpush.msrb.mxu2 %v177_v48 }
 0x131   :  { %203 = vmatpush.msrb.mxu2 %v176_v49 }
 0x133   :  { %204 = vmatpush.msrb.mxu2 %v175_v50 }
 0x134   :  { %238 = vmatmul.msk.f32.vlgmr.msrb.gmra.mxu2 %vm133_vm1, %v179_v51 }
 0x1b7   :  { %v206_v53 = vpop.f32.mrf.mxu2 }
 0x1b8   :  { %v207_v54 = vadd.f32 %v206_v53, %v184_v52 }
 0x1ba   :  { %253 = vtanh.f32 %v207_v54 }
 0x1c0   :  { %v254_v55 = vpop.eup %253 }
 0x1c1   :  { %v210_v56 = vmul.f32 2.0, %v254_v55 }
 0x1c3   :  { %212 = vst.msk [vmem:[#allocation2] sm:$0xff] %vm211_vm2, %v210_v56 }
 0x1c4   :  { %223 = dma.vmem_to_hbm [thread:$0]  %s219_s10, 128, %s221_s13, [#allocation3]  }
 0x1c5   :  { %279 = dma.done.wait [#allocation3], 128  }
 0x1c6   :  { %280 = vsyncadd [#allocation3], 4294967168 }
 0x1c7   :  { %228 = vsyncpa [#allocation3], 1 }

</bundles_post_ra>
